<compile_context>
chip_gen: v7x
topology: tpu7x:2x2x1
jax: 0.10.0
libtpu: 0.0.40
codegen_flags: <defaults>
</compile_context>

<pallas_src>
import functools

import jax
import jax.numpy as jnp
from jax import lax
from jax.experimental import pallas as pl
from jax.experimental.pallas import tpu as pltpu


# ---------------------------------------------------------------------------
# Stage 1: fc(x) + attention logits, tiled over node rows
# ---------------------------------------------------------------------------
def _fc_logits_kernel(x_ref, w_ref, almat_t_ref, armat_ref,
                      feat_ref, elt_ref, er_ref):
    x = x_ref[...].astype(jnp.bfloat16)
    w = w_ref[...].astype(jnp.bfloat16)
    feat = jnp.dot(x, w, preferred_element_type=jnp.float32)          # (tm, HF)
    # attention logits kept in f32 (softmax precision); tiny matmuls.
    er_ref[...] = jnp.dot(feat, armat_ref[...],
                          preferred_element_type=jnp.float32)         # (tm, H)
    elt_ref[...] = lax.dot_general(almat_t_ref[...], feat,
                                   (((1,), (1,)), ((), ())),
                                   preferred_element_type=jnp.float32)  # (H, tm)
    feat_ref[...] = feat.astype(jnp.bfloat16)


# ---------------------------------------------------------------------------
# Stage 2: online (flash-style) masked edge-softmax + aggregation
#   grid = (dst tiles "parallel", src tiles "arbitrary")
# ---------------------------------------------------------------------------
def _attn_agg_kernel(adj_ref, er_ref, elt_ref, feat_ref, b_ref, o_ref,
                     m_sc, l_sc, acc_sc, *,
                     num_heads, out_feats, out_pad, attn_slope, act_slope):
    H, F = num_heads, out_feats
    HF = H * F
    j = pl.program_id(1)
    last_j = pl.num_programs(1) - 1

    @pl.when(j == 0)
    def _():
        m_sc[...] = jnp.full_like(m_sc, -jnp.inf)
        l_sc[...] = jnp.zeros_like(l_sc)
        acc_sc[...] = jnp.zeros_like(acc_sc)

    # mask built ONCE per (dst, src) tile, shared across all heads
    mask = (adj_ref[...] > 0).astype(jnp.float32)                     # (td, ts)
    er = er_ref[...]                                                  # (td, H) f32
    elt = elt_ref[...]                                                # (H, ts) f32
    feat = feat_ref[...]                                              # (ts, HF) bf16

    for h in range(H):
        # e[v, u] = leaky_relu(el[u] + er[v]); el row broadcasts along sublanes
        e = er[:, h:h + 1] + elt[h:h + 1, :]                          # (td, ts)
        e = jnp.maximum(e, attn_slope * e)                            # leaky-relu
        m_old = m_sc[h]                                               # (td, 1)
        m_new = jnp.maximum(m_old, jnp.max(e, axis=1, keepdims=True))
        a = jnp.exp(m_old - m_new)                                    # correction
        p = jnp.exp(e - m_new) * mask                                 # mask after exp
        l_sc[h] = a * l_sc[h] + jnp.sum(p, axis=1, keepdims=True)
        acc_sc[h] = a * acc_sc[h] + jnp.dot(
            p.astype(jnp.bfloat16), feat[:, h * F:(h + 1) * F],
            preferred_element_type=jnp.float32)                       # (td, F)
        m_sc[h] = m_new

    @pl.when(j == last_j)
    def _():
        outs = []
        for h in range(H):
            l = l_sc[h]                                               # (td, 1)
            inv = jnp.where(l > 0.0, pl.reciprocal(l, approx=True), 0.0)
            outs.append(acc_sc[h] * inv)                              # deferred norm
        out = jnp.concatenate(outs, axis=1) + b_ref[...]              # (td, HF)
        if act_slope is not None:   # GATConv activation = F.leaky_relu (0.01)
            out = jnp.maximum(out, act_slope * out)
        if out_pad > HF:            # lane-dense store (pad to multiple of 128)
            out = jnp.concatenate(
                [out, jnp.zeros((out.shape[0], out_pad - HF), jnp.float32)],
                axis=1)
        o_ref[...] = out.astype(o_ref.dtype)


def _pick_tile(n, cap):
    """n is a multiple of 128; return the largest tile <= cap dividing n."""
    t = min(cap, n)
    while n % t:
        t -= 128
    return t


def _vmem_limit_bytes():
    try:
        cap = int(pltpu.get_tpu_info().vmem_capacity_bytes)
    except Exception:
        cap = 64 * 2 ** 20
    # never request more than 3/4 of physical VMEM (v7x has only 64 MiB)
    return int(min(64 * 2 ** 20, (cap * 3) // 4))


def gatconv(x, adj_t, w, almat_t, armat, bias, *, num_heads, out_feats,
            activation_slope=None, attn_slope=0.2, out_dtype=jnp.float32):
    """One DGL-style GATConv layer: row-tiled fc+logits, then a 2-D
    (dst-parallel, src-arbitrary) online-softmax attention/aggregation."""
    n, din = x.shape
    H, F = num_heads, out_feats
    HF = H * F
    out_pad = pl.cdiv(HF, 128) * 128

    # ---- Stage 1 -----------------------------------------------------------
    tm = _pick_tile(n, 256)
    feat, elt, er = pl.pallas_call(
        _fc_logits_kernel,
        out_shape=(jax.ShapeDtypeStruct((n, HF), jnp.bfloat16),
                   jax.ShapeDtypeStruct((H, n), jnp.float32),
                   jax.ShapeDtypeStruct((n, H), jnp.float32)),
        grid=(n // tm,),
        in_specs=[pl.BlockSpec((tm, din), lambda i: (i, 0)),
                  pl.BlockSpec((din, HF), lambda i: (0, 0)),
                  pl.BlockSpec((H, HF), lambda i: (0, 0)),
                  pl.BlockSpec((HF, H), lambda i: (0, 0))],
        out_specs=[pl.BlockSpec((tm, HF), lambda i: (i, 0)),
                   pl.BlockSpec((H, tm), lambda i: (0, i)),
                   pl.BlockSpec((tm, H), lambda i: (i, 0))],
        compiler_params=pltpu.CompilerParams(
            dimension_semantics=("parallel",)),
    )(x, w, almat_t, armat)

    # ---- Stage 2 -----------------------------------------------------------
    td = _pick_tile(n, 256)   # destination tile (128-256, v7x-safe)
    ts = _pick_tile(n, 256)   # source tile (bounds VMEM to O(td*ts))

    kern = functools.partial(
        _attn_agg_kernel, num_heads=H, out_feats=F, out_pad=out_pad,
        attn_slope=attn_slope, act_slope=activation_slope)

    out = pl.pallas_call(
        kern,
        out_shape=jax.ShapeDtypeStruct((n, out_pad), out_dtype),
        grid=(n // td, n // ts),
        in_specs=[pl.BlockSpec((td, ts), lambda i, j: (i, j)),   # adj_t (int8)
                  pl.BlockSpec((td, H), lambda i, j: (i, 0)),    # er (dst-tiled)
                  pl.BlockSpec((H, ts), lambda i, j: (0, j)),    # el^T (src-tiled)
                  pl.BlockSpec((ts, HF), lambda i, j: (j, 0)),   # feat (src-tiled)
                  pl.BlockSpec((1, HF), lambda i, j: (0, 0))],   # bias
        out_specs=pl.BlockSpec((td, out_pad), lambda i, j: (i, 0)),
        scratch_shapes=[pltpu.VMEM((H, td, 1), jnp.float32),     # running max
                        pltpu.VMEM((H, td, 1), jnp.float32),     # running denom
                        pltpu.VMEM((H, td, F), jnp.float32)],    # running acc
        compiler_params=pltpu.CompilerParams(
            dimension_semantics=("parallel", "arbitrary"),
            vmem_limit_bytes=_vmem_limit_bytes()),
    )(adj_t, er, elt, feat, bias)

    if out_pad != HF:
        out = out[:, :HF]
    return out


def _attn_mats(attn_l, attn_r):
    """Block-diagonal projections so per-node logits are single contractions:
    er = feat @ armat (N,H); el^T = almat_t @ feat^T (H,N)."""
    H, F = attn_l.shape
    eye = jnp.eye(H, dtype=jnp.float32)
    almat_t = (eye[:, :, None] * attn_l[:, None, :]).reshape(H, H * F)   # (H, HF)
    armat = (attn_r[:, :, None] * eye[:, None, :]).reshape(H * F, H)     # (HF, H)
    return almat_t, armat


class GATPallas:
    """Mirrors grb GAT(in_features, out_features, hidden_features, num_heads)
    with layer_norm=False (default) and forward-default dropout=0."""

    def __init__(self, in_features, out_features, hidden_features, num_heads,
                 key):
        act = 0.01  # F.leaky_relu default negative_slope (GATConv activation)
        configs = [(in_features, hidden_features[0], num_heads, act)]
        for i in range(len(hidden_features) - 1):
            configs.append((hidden_features[i] * num_heads,
                            hidden_features[i + 1], num_heads, act))
        # Last layer reproduces the reference exactly:
        #   GATConv(hidden[-1]*H, num_heads, out_features)
        #   -> out_feats = num_heads, heads = out_features, no activation.
        configs.append((hidden_features[-1] * num_heads, num_heads,
                        out_features, None))
        self.configs = configs

        self.params = []
        for din, fout, heads, _ in configs:
            key, k1, k2, k3 = jax.random.split(key, 4)
            hf = heads * fout
            # xavier_normal-style init (gain ~ sqrt(2)), close to DGL GATConv
            w = jax.random.normal(k1, (din, hf), jnp.float32) \
                * jnp.sqrt(4.0 / (din + hf))
            al = jax.random.normal(k2, (heads, fout), jnp.float32) \
                * jnp.sqrt(4.0 / (1.0 + fout))
            ar = jax.random.normal(k3, (heads, fout), jnp.float32) \
                * jnp.sqrt(4.0 / (1.0 + fout))
            almat_t, armat = _attn_mats(al, ar)
            b = jnp.zeros((1, hf), jnp.float32)
            self.params.append((w, almat_t, armat, b))

    def __call__(self, x, adj, dropout=0.0):
        # TODO(synk): dropout > 0 not implemented (forward default is 0 -> identity).
        # Only graph structure matters (DGL GATConv ignores edge weights):
        # adjacency is binarized to int8 [dst, src] and padded (with x) so the
        # node count is a multiple of 128 -> tiles never fall back to tile=N.
        N = x.shape[0]
        n_pad = max(128, ((N + 127) // 128) * 128)
        adj_t = (jnp.transpose(adj) > 0).astype(jnp.int8)
        if n_pad != N:
            pad = n_pad - N
            adj_t = jnp.pad(adj_t, ((0, pad), (0, pad)))
            x = jnp.pad(x, ((0, pad), (0, 0)))

        num_layers = len(self.configs)
        for idx, ((din, fout, heads, act), (w, almat_t, armat, b)) in enumerate(
                zip(self.configs, self.params)):
            last = idx == num_layers - 1
            x = gatconv(x, adj_t, w, almat_t, armat, b, num_heads=heads,
                        out_feats=fout, activation_slope=act,
                        out_dtype=jnp.float32 if last else jnp.bfloat16)
            # DGL's .flatten(1) of the (N, H, F) output is already this
            # head-major (N, H*F) layout.
        return x[:N]


if __name__ == "__main__":
    key = jax.random.PRNGKey(0)
    k_x, k_adj, k_params = jax.random.split(key, 3)

    N = 500              # pads to 512 -> 2x2 grid in stage 2 (exercises online softmax)
    in_features = 32
    hidden_features = [32, 32]
    num_heads = 4
    out_features = 8

    x = jax.random.normal(k_x, (N, in_features), jnp.float32)
    # dense adjacency (edge u->v), self-loops so every node has in-degree > 0
    adj = jax.random.bernoulli(k_adj, 0.05, (N, N)).astype(jnp.float32)
    adj = jnp.maximum(adj, jnp.eye(N, dtype=jnp.float32))

    model = GATPallas(in_features, out_features, hidden_features, num_heads,
                      k_params)
    out = model(x, adj, dropout=0.0)
    out = jax.block_until_ready(out)

    expected_dim = out_features * num_heads  # last layer: heads=out_features, F=num_heads
    assert out.shape == (N, expected_dim), out.shape
    assert bool(jnp.all(jnp.isfinite(out)))
    print("KERNEL_OK")
</pallas_src>

<mosaic_0001>
module attributes {stable_mosaic.version = 11 : i64} {
  func.func @_fc_logits_kernel(%arg0: i32, %arg1: memref<256x32xf32, #tpu.memory_space<vmem>>, %arg2: memref<32x128xf32, #tpu.memory_space<vmem>>, %arg3: memref<4x128xf32, #tpu.memory_space<vmem>>, %arg4: memref<128x4xf32, #tpu.memory_space<vmem>>, %arg5: memref<256x128xbf16, #tpu.memory_space<vmem>>, %arg6: memref<4x256xf32, #tpu.memory_space<vmem>>, %arg7: memref<256x4xf32, #tpu.memory_space<vmem>>) attributes {dimension_semantics = [#tpu.dimension_semantics<parallel>], iteration_bounds = array<i64: 2>, scalar_prefetch = 0 : i64, scratch_operands = 0 : i64, tpu.core_type = #tpu.core_type<tc>, window_params = [{transform_indices = @transform_0, window_bounds = array<i64: 256, 32>}, {pipeline_mode = #tpu.pipeline_mode<synchronous>, transform_indices = @transform_1, window_bounds = array<i64: 32, 128>}, {pipeline_mode = #tpu.pipeline_mode<synchronous>, transform_indices = @transform_2, window_bounds = array<i64: 4, 128>}, {pipeline_mode = #tpu.pipeline_mode<synchronous>, transform_indices = @transform_3, window_bounds = array<i64: 128, 4>}, {transform_indices = @transform_4, window_bounds = array<i64: 256, 128>}, {transform_indices = @transform_5, window_bounds = array<i64: 4, 256>}, {transform_indices = @transform_6, window_bounds = array<i64: 256, 4>}]} {
    %c0 = arith.constant 0 : index
    %c0_0 = arith.constant 0 : index
    %0 = vector.load %arg1[%c0, %c0_0] : memref<256x32xf32, #tpu.memory_space<vmem>>, vector<256x32xf32>
    %1 = arith.truncf %0 : vector<256x32xf32> to vector<256x32xbf16>
    %c0_1 = arith.constant 0 : index
    %c0_2 = arith.constant 0 : index
    %2 = vector.load %arg2[%c0_1, %c0_2] : memref<32x128xf32, #tpu.memory_space<vmem>>, vector<32x128xf32>
    %3 = arith.truncf %2 : vector<32x128xf32> to vector<32x128xbf16>
    %cst = arith.constant dense<0.000000e+00> : vector<256x128xf32>
    %4 = tpu.matmul %1, %3, %cst {dimension_numbers = #tpu.dot_dimension_numbers<[1], [0], [0], [1], [0, 0, 1, 1], [], []>} : vector<256x32xbf16>, vector<32x128xbf16>, vector<256x128xf32> -> vector<256x128xf32>
    %c0_3 = arith.constant 0 : index
    %c0_4 = arith.constant 0 : index
    %5 = vector.load %arg4[%c0_3, %c0_4] : memref<128x4xf32, #tpu.memory_space<vmem>>, vector<128x4xf32>
    %cst_5 = arith.constant dense<0.000000e+00> : vector<256x4xf32>
    %6 = tpu.matmul %4, %5, %cst_5 {dimension_numbers = #tpu.dot_dimension_numbers<[1], [0], [0], [1], [0, 0, 1, 1], [], []>} : vector<256x128xf32>, vector<128x4xf32>, vector<256x4xf32> -> vector<256x4xf32>
    %c0_6 = arith.constant 0 : index
    %c0_7 = arith.constant 0 : index
    %7 = vector.load %arg7[%c0_6, %c0_7] : memref<256x4xf32, #tpu.memory_space<vmem>>, vector<256x4xf32>
    tpu.vector_store %arg7[%c0_6, %c0_7], %6 {strides = array<i32>} : memref<256x4xf32, #tpu.memory_space<vmem>>, vector<256x4xf32>,
    %c0_8 = arith.constant 0 : index
    %c0_9 = arith.constant 0 : index
    %8 = vector.load %arg3[%c0_8, %c0_9] : memref<4x128xf32, #tpu.memory_space<vmem>>, vector<4x128xf32>
    %cst_10 = arith.constant dense<0.000000e+00> : vector<4x256xf32>
    %9 = tpu.matmul %8, %4, %cst_10 {dimension_numbers = #tpu.dot_dimension_numbers<[1], [1], [0], [0], [0, 0, 1, 0], [], []>} : vector<4x128xf32>, vector<256x128xf32>, vector<4x256xf32> -> vector<4x256xf32>
    %c0_11 = arith.constant 0 : index
    %c0_12 = arith.constant 0 : index
    %10 = vector.load %arg6[%c0_11, %c0_12] : memref<4x256xf32, #tpu.memory_space<vmem>>, vector<4x256xf32>
    tpu.vector_store %arg6[%c0_11, %c0_12], %9 {strides = array<i32>} : memref<4x256xf32, #tpu.memory_space<vmem>>, vector<4x256xf32>,
    %11 = arith.truncf %4 : vector<256x128xf32> to vector<256x128xbf16>
    %c0_13 = arith.constant 0 : index
    %c0_14 = arith.constant 0 : index
    %12 = vector.load %arg5[%c0_13, %c0_14] : memref<256x128xbf16, #tpu.memory_space<vmem>>, vector<256x128xbf16>
    tpu.vector_store %arg5[%c0_13, %c0_14], %11 {strides = array<i32>} : memref<256x128xbf16, #tpu.memory_space<vmem>>, vector<256x128xbf16>,
    return
  }
  func.func @transform_0(%arg0: i32) -> (i32, i32) {
    %c0_i32 = arith.constant 0 : i32
    %c0_i32_0 = arith.constant 0 : i32
    return %arg0, %c0_i32 : i32, i32
  }
  func.func @transform_1(%arg0: i32) -> (i32, i32) {
    %c0_i32 = arith.constant 0 : i32
    %c0_i32_0 = arith.constant 0 : i32
    %c0_i32_1 = arith.constant 0 : i32
    return %c0_i32, %c0_i32_0 : i32, i32
  }
  func.func @transform_2(%arg0: i32) -> (i32, i32) {
    %c0_i32 = arith.constant 0 : i32
    %c0_i32_0 = arith.constant 0 : i32
    %c0_i32_1 = arith.constant 0 : i32
    return %c0_i32, %c0_i32_0 : i32, i32
  }
  func.func @transform_3(%arg0: i32) -> (i32, i32) {
    %c0_i32 = arith.constant 0 : i32
    %c0_i32_0 = arith.constant 0 : i32
    %c0_i32_1 = arith.constant 0 : i32
    return %c0_i32, %c0_i32_0 : i32, i32
  }
  func.func @transform_4(%arg0: i32) -> (i32, i32) {
    %c0_i32 = arith.constant 0 : i32
    %c0_i32_0 = arith.constant 0 : i32
    return %arg0, %c0_i32 : i32, i32
  }
  func.func @transform_5(%arg0: i32) -> (i32, i32) {
    %c0_i32 = arith.constant 0 : i32
    %c0_i32_0 = arith.constant 0 : i32
    return %c0_i32, %arg0 : i32, i32
  }
  func.func @transform_6(%arg0: i32) -> (i32, i32) {
    %c0_i32 = arith.constant 0 : i32
    %c0_i32_0 = arith.constant 0 : i32
    return %arg0, %c0_i32 : i32, i32
  }
}

</mosaic_0001>

<bundles_post_ra>
// kernel: tpu_custom_call.1
= control target key start
LH: loop header
LB: loop body
LE: loop exit
PB: predicated region body
PF: predicated region fallthrough
CT: control target
= control target key end

     0   :  { %12 = vsyncpa [#allocation3], 0  ;;  %s2247_s0 = inlined_call_operand.vmem [shape: f32[512,32], index: 0, kind: input, shape index: {}]   ;;  %s2248_s1 = inlined_call_operand.vmem [shape: f32[32,128], index: 1, kind: input, shape index: {}]   ;;  %s2249_s2 = inlined_call_operand.vmem [shape: f32[4,128], index: 2, kind: input, shape index: {}]   ;;  %s2250_s3 = inlined_call_operand.vmem [shape: f32[128,4], index: 3, kind: input, shape index: {}]   ;;  %s2251_s4 = inlined_call_operand.hbm [shape: bf16[512,128], index: 4, kind: output, shape index: {0}]   ;;  %s2252_s5 = inlined_call_operand.hbm [shape: f32[4,512], index: 5, kind: output, shape index: {1}]   ;;  %s2253_s6 = inlined_call_operand.vmem [shape: f32[512,4], index: 6, kind: output, shape index: {2}]  }
   0x1   :  { %14 = vsyncpa [#allocation3 + $0x1], 0 }
   0x2   :  { %15 = vsyncpa [#allocation5], 0 }
   0x3   :  { %17 = vsyncpa [#allocation5 + $0x1], 0  ;;  %s1871_s21 = smov 0   ;;  %s1873_s22 = smov 0  }
   0x4   :  { %s1875_s23 = smov 0   ;;  %s1877_s24 = smov 0  }
   0x5 LB: > { %s1892_s25 = sadd.s32 4294967295, %s1830_s24   ;;  %s1215_s26 = sadd.s32 4294967294, %s1830_s24   ;;  %s1830_s24 = sphi %s1877_s24, %s2259_s24   ;;  %s1826_s23 = sphi %s1875_s23, %s2258_s23   ;;  %s1822_s22 = sphi %s1873_s22, %s2257_s22   ;;  %s1818_s21 = sphi %s1871_s21, %s2256_s21  }
   0x6   : > { %s1896_s27 = sadd.s32 1, %s1830_s24   ;;  %s119_s28 = sadd.s32 1, %s1826_s23 }
   0x7   : > { %s116_s29 = ssub.s32 %s1830_s24, %s1896_s27  ;;  %p129_p0 = scmp.ne.s32.totalorder %s1826_s23, %s1822_s22 }
   0x8   : > { %p117_p1 = scmp.eq.s32.totalorder %s116_s29, 0  ;;  %p130_p2 = scmp.eq.s32.totalorder %s1892_s25, 1 }
   0x9   : > { %p135_p3 = scmp.ne.s32.totalorder %s1822_s22, %s1818_s21  ;;  %p136_p4 = scmp.eq.s32.totalorder %s1215_s26, 1 }
   0xa   : > { %s1907_s30 = scalar_select %p117_p1, %s1826_s23, %s119_s28  }
   0xb   : > { %p1909_p5 = por %p130_p2, %p129_p0  ;;  %p1913_p6 = por %p136_p4, %p135_p3 }
   0xc   : > { %p1218_p7 = scmp.ge.s32.totalorder %s1830_s24, 1  ;;  %p224_p8 = scmp.lt.s32.totalorder %s1830_s24, 3 }
   0xe   : > { %p225_p9 = pnand %p1218_p7, %p224_p8 }
   0xf   : > { %v327_v0 = vld [vmem:[%s2248_s1] sm:$0xff] (!%p225_p9)  ;;  %v328_v1 = vld [vmem:[%s2248_s1 + $0x8] sm:$0xff] (!%p225_p9)  ;;  %v329_v2 = vld [vmem:[%s2248_s1 + $0x10] sm:$0xff] (!%p225_p9)  ;;  %s1221_s15 = sshll.u32 (!%p225_p9), %s1892_s25, 5  ;;  %vm333_vm0 = vcmask (!%p225_p9), 261120   ;;  %s1313_s20 = sshll.u32 (!%p225_p9), %s1892_s25, 11 }
  0x10   : > { %228 = sbr.rel (%p225_p9) target bundleno = 572 (0x23c), region = 36  ;;  %v331_v3 = vpack.c.bf16 (!%p225_p9), %v328_v1, %v327_v0  ;;  %v330_v4 = vld [vmem:[%s2248_s1 + $0x18] sm:$0xff] (!%p225_p9)  ;;  %p265_p10 = scmp.lt.s32.totalorder (!%p225_p9), %s1221_s15, 63  ;;  %v543_v5 = vld [vmem:[%s2250_s3] sm:$0xff] (!%p225_p9)  ;;  %v544_v6 = vld [vmem:[%s2250_s3 + $0x8] sm:$0xff] (!%p225_p9) }
  0x11   : > { %v332_v7 = vpack.c.bf16 (!%p225_p9), %v330_v4, %v329_v2  ;;  %v1626_v8 = vpack.c.bf16 (!%p225_p9), %v544_v6, %v543_v5  ;;  %v545_v9 = vld [vmem:[%s2250_s3 + $0x10] sm:$0xff] (!%p225_p9)  ;;  %v546_v10 = vld [vmem:[%s2250_s3 + $0x18] sm:$0xff] (!%p225_p9)  ;;  %v547_v12 = vld [vmem:[%s2250_s3 + $0x20] sm:$0xff] (!%p225_p9)  ;;  %s2100_s9 = scalar_lea.hbm (!%p225_p9), %s2251_s4, %s1313_s20  ;;  %s1832_s12 = smov (!%p225_p9), [#allocation2]  }
  0x12   : > { %1510 = vmatprep.subr.bf16.mxu0 (!%p225_p9), %v331_v3  ;;  %v1630_v11 = vpack.c.bf16 (!%p225_p9), %v546_v10, %v545_v9  ;;  %v548_v13 = vld [vmem:[%s2250_s3 + $0x28] sm:$0xff] (!%p225_p9)  ;;  %v549_v15 = vld [vmem:[%s2250_s3 + $0x30] sm:$0xff] (!%p225_p9)  ;;  %v550_v16 = vld [vmem:[%s2250_s3 + $0x38] sm:$0xff] (!%p225_p9)  ;;  %s1740_s13 = sshll.u32 (!%p225_p9), %s1832_s12, 4  ;;  %s1741_s13 = int_to_ptr.vmem [resolvable:$false] %s1740_s13 }
  0x13   : > { %1511 = vmatpush3.bf16.msra.mxu0 (!%p225_p9), %v331_v3  ;;  %1627 = vmatprep.subr.bf16.mxu1 (!%p225_p9), %v1626_v8  ;;  %v1634_v14 = vpack.c.bf16 (!%p225_p9), %v548_v13, %v547_v12  ;;  %v1638_v26 = vpack.c.bf16 (!%p225_p9), %v550_v16, %v549_v15  ;;  %v551_v27 = vld [vmem:[%s2250_s3 + $0x40] sm:$0xff] (!%p225_p9)  ;;  %v552_v28 = vld [vmem:[%s2250_s3 + $0x48] sm:$0xff] (!%p225_p9)  ;;  %v553_v35 = vld [vmem:[%s2250_s3 + $0x50] sm:$0xff] (!%p225_p9)  ;;  %s1742_s14 = scalar_lea.vmem (!%p225_p9), %s1741_s13, 4096 }
  0x14   : > { %1512 = vmatprep.subr.bf16.mxu0 (!%p225_p9), %v332_v7  ;;  %1629 = vmatpush3.bf16.msra.mxu1 (!%p225_p9), %v1626_v8  ;;  %v1642_v33 = vpack.c.bf16 (!%p225_p9), %v552_v28, %v551_v27  ;;  %v554_v36 = vld [vmem:[%s2250_s3 + $0x58] sm:$0xff] (!%p225_p9)  ;;  %v555_v39 = vld [vmem:[%s2250_s3 + $0x60] sm:$0xff] (!%p225_p9)  ;;  %v556_v40 = vld [vmem:[%s2250_s3 + $0x68] sm:$0xff] (!%p225_p9) }
  0x15   : > { %1631 = vmatprep.subr.bf16.mxu1 (!%p225_p9), %v1630_v11  ;;  %v1646_v38 = vpack.c.bf16 (!%p225_p9), %v554_v36, %v553_v35  ;;  %v1650_v45 = vpack.c.bf16 (!%p225_p9), %v556_v40, %v555_v39  ;;  %v558_v12 = vld [vmem:[%s2250_s3 + $0x78] sm:$0xff] (!%p225_p9) }
  0x17   : > { %s2261_s15 = smov (!%p265_p10, %s1221_s15), 63  ;;  %1513 = vmatpush3.bf16.msra.mxu0 %v332_v7 }
  0x18   : > { %s1222_s16 = sshll.u32 %s2261_s15, 3  ;;  %1633 = vmatpush3.bf16.msra.mxu1 %v1630_v11  ;;  %v557_v11 = vld [vmem:[%s2250_s3 + $0x70] sm:$0xff] }
  0x19   : > { %s1958_s19 = scalar_lea.vmem %s2247_s0, %s1222_s16  ;;  %1635 = vmatprep.subr.bf16.mxu1 %v1634_v14  ;;  %v1654_v13 = vpack.c.bf16 %v558_v12, %v557_v11 }
  0x1a   : > { %v279_v17 = vld [vmem:[%s1958_s19] sm:$0xff]  ;;  %v280_v18 = vld [vmem:[%s1958_s19 + $0x8] sm:$0xff]  ;;  %v281_v19 = vld [vmem:[%s1958_s19 + $0x10] sm:$0xff] }
  0x1b   : > { %v311_v20 = vpack.c.bf16 %v280_v18, %v279_v17  ;;  %v282_v21 = vld [vmem:[%s1958_s19 + $0x18] sm:$0xff]  ;;  %v283_v22 = vld [vmem:[%s1958_s19 + $0x20] sm:$0xff]  ;;  %v284_v23 = vld [vmem:[%s1958_s19 + $0x28] sm:$0xff] }
  0x1c   : > { %v312_v24 = vpack.c.bf16 %v282_v21, %v281_v19  ;;  %v313_v25 = vpack.c.bf16 %v284_v23, %v283_v22  ;;  %v285_v29 = vld [vmem:[%s1958_s19 + $0x30] sm:$0xff]  ;;  %v286_v30 = vld [vmem:[%s1958_s19 + $0x38] sm:$0xff]  ;;  %v287_v31 = vld [vmem:[%s1958_s19 + $0x40] sm:$0xff]  ;;  %1637 = vmatpush3.bf16.msra.mxu1 %v1634_v14 }
  0x1d   : > { %1514 = vmatprep.mubr.msk.bf16.mxu0 %vm333_vm0, %v311_v20  ;;  %v288_v32 = vld [vmem:[%s1958_s19 + $0x48] sm:$0xff]  ;;  %1639 = vmatprep.subr.bf16.mxu1 %v1638_v26  ;;  %v314_v34 = vpack.c.bf16 %v286_v30, %v285_v29  ;;  %v289_v41 = vld [vmem:[%s1958_s19 + $0x50] sm:$0xff]  ;;  %v290_v42 = vld [vmem:[%s1958_s19 + $0x58] sm:$0xff] }
  0x1e   : > { %1515 = vmatmul.mubr.msk.bf16.vlgmr.msra.gmra.mrb[0].mxu0 %vm333_vm0, %v312_v24  ;;  %v315_v37 = vpack.c.bf16 %v288_v32, %v287_v31  ;;  %v291_v43 = vld [vmem:[%s1958_s19 + $0x60] sm:$0xff]  ;;  %v292_v44 = vld [vmem:[%s1958_s19 + $0x68] sm:$0xff]  ;;  %v316_v46 = vpack.c.bf16 %v290_v42, %v289_v41  ;;  %v293_v48 = vld [vmem:[%s1958_s19 + $0x70] sm:$0xff] }
  0x1f   : > { %1518 = vmatprep.mubr.msk.bf16.mxu0 %vm333_vm0, %v313_v25  ;;  %v317_v47 = vpack.c.bf16 %v292_v44, %v291_v43  ;;  %v294_v49 = vld [vmem:[%s1958_s19 + $0x78] sm:$0xff]  ;;  %v295_v50 = vld [vmem:[%s1958_s19 + $0x80] sm:$0xff]  ;;  %v296_v51 = vld [vmem:[%s1958_s19 + $0x88] sm:$0xff] }
  0x20   : > { %1641 = vmatpush3.bf16.msra.mxu1 %v1638_v26  ;;  %v318_v52 = vpack.c.bf16 %v294_v49, %v293_v48  ;;  %v319_v53 = vpack.c.bf16 %v296_v51, %v295_v50  ;;  %v297_v54 = vld [vmem:[%s1958_s19 + $0x90] sm:$0xff]  ;;  %v298_v55 = vld [vmem:[%s1958_s19 + $0x98] sm:$0xff]  ;;  %v299_v56 = vld [vmem:[%s1958_s19 + $0xa0] sm:$0xff] }
  0x21   : > { %1643 = vmatprep.subr.bf16.mxu1 %v1642_v33  ;;  %v300_v57 = vld [vmem:[%s1958_s19 + $0xa8] sm:$0xff]  ;;  %v320_v58 = vpack.c.bf16 %v298_v55, %v297_v54  ;;  %v301_v60 = vld [vmem:[%s1958_s19 + $0xb0] sm:$0xff]  ;;  %v302_v61 = vld [vmem:[%s1958_s19 + $0xb8] sm:$0xff] }
  0x22   : > { %v321_v59 = vpack.c.bf16 %v300_v57, %v299_v56  ;;  %v303_v62 = vld [vmem:[%s1958_s19 + $0xc0] sm:$0xff]  ;;  %v304_v63 = vld [vmem:[%s1958_s19 + $0xc8] sm:$0xff]  ;;  %v322_v0 = vpack.c.bf16 %v302_v61, %v301_v60  ;;  %v305_v2 = vld [vmem:[%s1958_s19 + $0xd0] sm:$0xff] }
  0x23   : > { %v323_v1 = vpack.c.bf16 %v304_v63, %v303_v62  ;;  %v306_v3 = vld [vmem:[%s1958_s19 + $0xd8] sm:$0xff]  ;;  %v307_v4 = vld [vmem:[%s1958_s19 + $0xe0] sm:$0xff]  ;;  %v308_v5 = vld [vmem:[%s1958_s19 + $0xe8] sm:$0xff] }
  0x24   : > { %1645 = vmatpush3.bf16.msra.mxu1 %v1642_v33  ;;  %v324_v6 = vpack.c.bf16 %v306_v3, %v305_v2  ;;  %v325_v7 = vpack.c.bf16 %v308_v5, %v307_v4  ;;  %v309_v8 = vld [vmem:[%s1958_s19 + $0xf0] sm:$0xff]  ;;  %v310_v9 = vld [vmem:[%s1958_s19 + $0xf8] sm:$0xff]  ;;  %v2041_v14 = vld [vmem:[%s2249_s2] sm:$0xf]  ;;  %s2045_s19 = sand.u32 1, %s1822_s22  }
  0x25   : > { %1647 = vmatprep.subr.bf16.mxu1 %v1646_v38  ;;  %v326_v10 = vpack.c.bf16 %v310_v9, %v309_v8  ;;  %s1219_s17 = sshll.u32 %s2045_s19, 7  ;;  %s1055_s10 = scalar_lea.sflag [#allocation3], %s2045_s19 }
  0x26   : > { %1519 = vmatmul.mubr.msk.bf16.gmra.mrb[4].mxu0 %vm333_vm0, %v314_v34  ;;  %s2050_s18 = scalar_lea.vmem [#allocation2], %s1219_s17 }
  0x27   : > { %1522 = vmatprep.mubr.msk.bf16.mxu0 %vm333_vm0, %v315_v37  ;;  %s1078_s26 = sshll.u32 %s2050_s18, 4  ;;  %s2102_s26 = int_to_ptr.vmem [resolvable:$true] %s1078_s26 }
  0x28   : > { %1649 = vmatpush3.bf16.msra.mxu1 %v1646_v38  ;;  %s1736_s11 = scalar_lea.vmem %s2102_s26, 2048  ;;  %p1743_p0 = scmp.lt.s32.totalorder %s2102_s26, %s1741_s13 }
  0x29   : > { %1651 = vmatprep.subr.bf16.mxu1 %v1650_v45  ;;  %p1737_p11 = scmp.ne.s32.totalorder %s2102_s26, %s1736_s11  ;;  %p1744_p1 = scmp.lt.s32.totalorder %s1742_s14, %s1736_s11 }
  0x2b   : > { %p1738_p12 = pnand %p1737_p11, %p1909_p5  ;;  %p1745_p2 = por %p1744_p1, %p1743_p0 }
  0x2c   : > { %1653 = vmatpush3.bf16.msra.mxu1 %v1650_v45 }
  0x2d   : > { %1655 = vmatprep.subr.bf16.mxu1 %v1654_v13  ;;  %p1739_p13 = pneg %p1738_p12 }
  0x2e   : > { %1523 = vmatmul.mubr.msk.bf16.gmra.mrb[8].mxu0 %vm333_vm0, %v316_v46 }
  0x2f   : > { %1526 = vmatprep.mubr.msk.bf16.mxu0 %vm333_vm0, %v317_v47  ;;  %p1746_p3 = pnand %p1745_p2, %p1739_p13 }
  0x30   : > { %1657 = vmatpush3.bf16.msra.mxu1 %v1654_v13 }
  0x36   : > { %1527 = vmatmul.mubr.msk.bf16.gmra.mrb[12].mxu0 %vm333_vm0, %v318_v52 }
  0x37   : > { %1530 = vmatprep.mubr.msk.bf16.mxu0 %vm333_vm0, %v319_v53 }
  0x3e   : > { %1531 = vmatmul.mubr.msk.bf16.gmra.mrb[16].mxu0 %vm333_vm0, %v320_v58 }
  0x3f   : > { %1534 = vmatprep.mubr.msk.bf16.mxu0 %vm333_vm0, %v321_v59 }
  0x46   : > { %1535 = vmatmul.mubr.msk.bf16.gmra.mrb[20].mxu0 %vm333_vm0, %v322_v0 }
  0x47   : > { %1538 = vmatprep.mubr.msk.bf16.mxu0 %vm333_vm0, %v323_v1 }
  0x4e   : > { %1539 = vmatmul.mubr.msk.bf16.gmra.mrb[24].mxu0 %vm333_vm0, %v324_v6 }
  0x4f   : > { %1542 = vmatprep.mubr.msk.bf16.mxu0 %vm333_vm0, %v325_v7 }
  0x56   : > { %1543 = vmatmul.mubr.msk.bf16.gmra.mrb[28].mxu0 %vm333_vm0, %v326_v10 }
  0x57   : > { %1508 = vmatprep.mubr.f32.mxu0 %v2041_v14 }
  0xf1   : > { %v1516_v15 = vpop.f32.mrb[0].mxu0 }
  0xf2   : > { %v416_v16 = vpop.f32.mrb[1].mxu0 }
  0xf3   : > { %v1517_v17 = vpop.f32.mrb[2].mxu0  ;;  %1578 = vmatprep.mubr.f32.mxu1 %v416_v16 }
  0xf4   : > { %v2048_v18 = vpack.c.bf16 %v1517_v17, %v1516_v15  ;;  %v419_v19 = vpop.f32.mrb[3].mxu0 }
  0xf5   : > { %v1660_v20 = vpack.c.bf16 %v419_v19, %v416_v16  ;;  %1579 = vmatmul.mubr.f32.vlgmr.msra.gmra.mrb[0].mxu1 %v419_v19 }
  0xf6   : > { %1395 = vst [vmem:[%s2050_s18 + $0x8] sm:$0xff] %v2048_v18   ;;  %1581 = vmatprep.mubr.f32.mxu1 %v1516_v15 }
  0xf7   : > { %1319 = vst [vmem:[%s2050_s18] sm:$0xff] %v1660_v20  }
  0xf9   : > { %v1520_v21 = vpop.f32.mrb[4].mxu0  ;;  %1582 = vmatmul.mubr.f32.gmra.mrb[2].mxu1 %v1517_v17 }
  0xfa   : > { %v432_v22 = vpop.f32.mrb[5].mxu0 }
  0xfb   : > { %v1521_v23 = vpop.f32.mrb[6].mxu0  ;;  %1584 = vmatprep.mubr.f32.mxu1 %v432_v22 }
  0xfc   : > { %v2055_v24 = vpack.c.bf16 %v1521_v23, %v1520_v21  ;;  %v435_v25 = vpop.f32.mrb[7].mxu0 }
  0xfd   : > { %v2057_v26 = vpack.c.bf16 %v435_v25, %v432_v22  ;;  %1585 = vmatmul.mubr.f32.gmra.mrb[4].mxu1 %v435_v25 }
  0xfe   : > { %1397 = vst [vmem:[%s2050_s18 + $0x18] sm:$0xff] %v2055_v24   ;;  %1587 = vmatprep.mubr.f32.mxu1 %v1520_v21 }
  0xff   : > { %1396 = vst [vmem:[%s2050_s18 + $0x10] sm:$0xff] %v2057_v26  }
 0x101   : > { %v1524_v27 = vpop.f32.mrb[8].mxu0  ;;  %1588 = vmatmul.mubr.f32.gmra.mrb[6].mxu1 %v1521_v23 }
 0x102   : > { %v448_v28 = vpop.f32.mrb[9].mxu0 }
 0x103   : > { %v1525_v29 = vpop.f32.mrb[10].mxu0  ;;  %1590 = vmatprep.mubr.f32.mxu1 %v448_v28 }
 0x104   : > { %v2063_v30 = vpack.c.bf16 %v1525_v29, %v1524_v27  ;;  %v451_v31 = vpop.f32.mrb[11].mxu0 }
 0x105   : > { %v2065_v32 = vpack.c.bf16 %v451_v31, %v448_v28  ;;  %1591 = vmatmul.mubr.f32.gmra.mrb[8].mxu1 %v451_v31 }
 0x106   : > { %1399 = vst [vmem:[%s2050_s18 + $0x28] sm:$0xff] %v2063_v30   ;;  %1593 = vmatprep.mubr.f32.mxu1 %v1524_v27 }
 0x107   : > { %1398 = vst [vmem:[%s2050_s18 + $0x20] sm:$0xff] %v2065_v32  }
 0x109   : > { %v1528_v33 = vpop.f32.mrb[12].mxu0  ;;  %1594 = vmatmul.mubr.f32.gmra.mrb[10].mxu1 %v1525_v29 }
 0x10a   : > { %v464_v34 = vpop.f32.mrb[13].mxu0 }
 0x10b   : > { %v1529_v35 = vpop.f32.mrb[14].mxu0  ;;  %1596 = vmatprep.mubr.f32.mxu1 %v464_v34 }
 0x10c   : > { %v2071_v36 = vpack.c.bf16 %v1529_v35, %v1528_v33  ;;  %v467_v37 = vpop.f32.mrb[15].mxu0 }
 0x10d   : > { %v2073_v38 = vpack.c.bf16 %v467_v37, %v464_v34  ;;  %1597 = vmatmul.mubr.f32.gmra.mrb[12].mxu1 %v467_v37 }
 0x10e   : > { %1401 = vst [vmem:[%s2050_s18 + $0x38] sm:$0xff] %v2071_v36   ;;  %1599 = vmatprep.mubr.f32.mxu1 %v1528_v33 }
 0x10f   : > { %1400 = vst [vmem:[%s2050_s18 + $0x30] sm:$0xff] %v2073_v38  }
 0x111   : > { %v1532_v39 = vpop.f32.mrb[16].mxu0  ;;  %1600 = vmatmul.mubr.f32.gmra.mrb[14].mxu1 %v1529_v35 }
 0x112   : > { %v480_v40 = vpop.f32.mrb[17].mxu0 }
 0x113   : > { %v1533_v41 = vpop.f32.mrb[18].mxu0  ;;  %1602 = vmatprep.mubr.f32.mxu1 %v480_v40 }
 0x114   : > { %v1662_v42 = vpack.c.bf16 %v1533_v41, %v1532_v39  ;;  %v483_v43 = vpop.f32.mrb[19].mxu0 }
 0x115   : > { %v1658_v44 = vpack.c.bf16 %v483_v43, %v480_v40  ;;  %1603 = vmatmul.mubr.f32.gmra.mrb[16].mxu1 %v483_v43 }
 0x116   : > { %1403 = vst [vmem:[%s2050_s18 + $0x48] sm:$0xff] %v1662_v42   ;;  %1605 = vmatprep.mubr.f32.mxu1 %v1532_v39 }
 0x117   : > { %1402 = vst [vmem:[%s2050_s18 + $0x40] sm:$0xff] %v1658_v44   ;;  %1659 = vmatprep.subr.bf16.mxu0 %v1658_v44 }
 0x118   : > { %1661 = vmatpush3.bf16.xpose.msra.mxu0 %v1660_v20 }
 0x119   : > { %v1536_v45 = vpop.f32.mrb[20].mxu0  ;;  %1606 = vmatmul.mubr.f32.gmra.mrb[18].mxu1 %v1533_v41  ;;  %1663 = vmatprep.subr.bf16.mxu0 %v1662_v42 }
 0x11a   : > { %v496_v46 = vpop.f32.mrb[21].mxu0 }
 0x11b   : > { %v1537_v47 = vpop.f32.mrb[22].mxu0  ;;  %1608 = vmatprep.mubr.f32.mxu1 %v496_v46 }
 0x11c   : > { %v1670_v48 = vpack.c.bf16 %v1537_v47, %v1536_v45  ;;  %v499_v49 = vpop.f32.mrb[23].mxu0 }
 0x11d   : > { %v1666_v50 = vpack.c.bf16 %v499_v49, %v496_v46  ;;  %1609 = vmatmul.mubr.f32.gmra.mrb[20].mxu1 %v499_v49 }
 0x11e   : > { %1405 = vst [vmem:[%s2050_s18 + $0x58] sm:$0xff] %v1670_v48   ;;  %1611 = vmatprep.mubr.f32.mxu1 %v1536_v45 }
 0x11f   : > { %1404 = vst [vmem:[%s2050_s18 + $0x50] sm:$0xff] %v1666_v50  }
 0x120   : > { %1665 = vmatpush3.bf16.xpose.msra.mxu0 %v2048_v18 }
 0x121   : > { %1612 = vmatmul.mubr.f32.gmra.mrb[22].mxu1 %v1537_v47  ;;  %1667 = vmatprep.subr.bf16.mxu0 %v1666_v50  ;;  %v1540_v51 = vpop.f32.mrb[24].mxu0 }
 0x122   : > { %v512_v52 = vpop.f32.mrb[25].mxu0 }
 0x123   : > { %v1541_v53 = vpop.f32.mrb[26].mxu0  ;;  %1614 = vmatprep.mubr.f32.mxu1 %v512_v52 }
 0x124   : > { %v1678_v54 = vpack.c.bf16 %v1541_v53, %v1540_v51  ;;  %v515_v55 = vpop.f32.mrb[27].mxu0 }
 0x125   : > { %v1674_v56 = vpack.c.bf16 %v515_v55, %v512_v52  ;;  %1615 = vmatmul.mubr.f32.gmra.mrb[24].mxu1 %v515_v55 }
 0x126   : > { %1407 = vst [vmem:[%s2050_s18 + $0x68] sm:$0xff] %v1678_v54   ;;  %1617 = vmatprep.mubr.f32.mxu1 %v1540_v51 }
 0x127   : > { %1406 = vst [vmem:[%s2050_s18 + $0x60] sm:$0xff] %v1674_v56  }
 0x128   : > { %1669 = vmatpush3.bf16.xpose.msra.mxu0 %v2057_v26 }
 0x129   : > { %1671 = vmatprep.subr.bf16.mxu0 %v1670_v48  ;;  %1618 = vmatmul.mubr.f32.gmra.mrb[26].mxu1 %v1541_v53  ;;  %v1544_v57 = vpop.f32.mrb[28].mxu0 }
 0x12a   : > { %v528_v58 = vpop.f32.mrb[29].mxu0 }
 0x12b   : > { %v1545_v59 = vpop.f32.mrb[30].mxu0  ;;  %1620 = vmatprep.mubr.f32.mxu1 %v528_v58 }
 0x12c   : > { %v1686_v60 = vpack.c.bf16 %v1545_v59, %v1544_v57  ;;  %v531_v61 = vpop.f32.mrb[31].mxu0 }
 0x12d   : > { %v1682_v62 = vpack.c.bf16 %v531_v61, %v528_v58  ;;  %1621 = vmatmul.mubr.f32.gmra.mrb[28].mxu1 %v531_v61 }
 0x12e   : > { %1409 = vst [vmem:[%s2050_s18 + $0x78] sm:$0xff] %v1686_v60   ;;  %1623 = vmatprep.mubr.f32.mxu1 %v1544_v57 }
 0x12f   : > { %1408 = vst [vmem:[%s2050_s18 + $0x70] sm:$0xff] %v1682_v62  }
 0x130   : > { %1673 = vmatpush3.bf16.xpose.msra.mxu0 %v2055_v24 }
 0x131   : > { %1675 = vmatprep.subr.bf16.mxu0 %v1674_v56  ;;  %1624 = vmatmul.mubr.f32.gmra.mrb[30].mxu1 %v1545_v59 }
 0x138   : > { %1677 = vmatpush3.bf16.xpose.msra.mxu0 %v2065_v32 }
 0x139   : > { %1679 = vmatprep.subr.bf16.mxu0 %v1678_v54 }
 0x140   : > { %1681 = vmatpush3.bf16.xpose.msra.mxu0 %v2063_v30 }
 0x141   : > { %1683 = vmatprep.subr.bf16.mxu0 %v1682_v62 }
 0x148   : > { %1685 = vmatpush3.bf16.xpose.msra.mxu0 %v2073_v38 }
 0x149   : > { %1687 = vmatprep.subr.bf16.mxu0 %v1686_v60 }
 0x150   : > { %1689 = vmatpush3.bf16.xpose.msra.mxu0 %v2071_v36 }
 0x157   : > { %1509 = vmatmul.mubr.f32.vlgmr.msra.gmra.mrb[32].mxu0 %v2041_v14 }
 0x158   : > { %1749 = shalt.err (!%p1746_p3)
}
 0x159   : > { %s1750_s17 = scalar_lea.hbm %s2100_s9, 2048  ;;  %s1754_s28 = scalar_lea.hbm %s2251_s4, 4096 }
 0x15a   : > { %p1751_p4 = scmp.ne.s32.totalorder %s2100_s9, %s1750_s17  ;;  %p1755_p9 = scmp.lt.u32.totalorder %s2100_s9, %s2251_s4 }
 0x15b   : > { %p1756_p10 = scmp.lt.u32.totalorder %s1754_s28, %s1750_s17  ;;  %p1758_p12 = scmp.lt.u32.totalorder %s1750_s17, %s2100_s9 }
 0x15c   : > { %p1752_p7 = pnand %p1751_p4, %p1909_p5 }
 0x15d   : > { %p1757_p11 = por %p1756_p10, %p1755_p9 }
 0x15e   : > { %p1753_p8 = pneg %p1752_p7 }
 0x15f   : > { %p1759_p13 = por %p1758_p12, %p1757_p11 }
 0x161   : > { %p1760_p0 = pnand %p1759_p13, %p1753_p8 }
 0x163   : > { %1763 = shalt.err (!%p1760_p0)
}
 0x164   : > { %s1833_s11 = smov 64   ;;  %s1834_s13 = smov 4   ;;  %vm784_vm1 = vcmask 31744  }
 0x165   : > { %1690 = dma.vmem_to_hbm [thread:$0]  (%p1909_p5), %s2102_s26, 2048, %s2100_s9, %s1055_s10, %s1833_s11, %s1833_s11, %s1834_s13  }
 0x166   : > { %s2133_s20 = scalar_lea.vmem %s2253_s6, %s1222_s16  ;;  %s1220_s15 = sshll.u32 %s2045_s19, 3 }
 0x167   : > { %s1314_s16 = sshll.u32 %s1892_s25, 7  ;;  %s256_s26 = scalar_lea.vmem [#allocation4], %s1220_s15 }
 0x168   : > { %s1095_s9 = sshll.u32 %s256_s26, 4  ;;  %s2204_s28 = scalar_lea.hbm %s2252_s5, %s1314_s16  ;;  %s2206_s9 = int_to_ptr.vmem [resolvable:$true] %s1095_s9 }
 0x169   : > { %s1060_s29 = scalar_lea.sflag [#allocation5], %s2045_s19  ;;  %s1764_s12 = scalar_lea.vmem %s2206_s9, 128 }
 0x16a   : > { %p1765_p1 = scmp.ne.s32.totalorder %s2206_s9, %s1764_s12  ;;  %s1835_s25 = smov [#allocation4]  }
 0x16b   : > { %s1768_s11 = sshll.u32 %s1835_s25, 4  ;;  %s1769_s11 = int_to_ptr.vmem [resolvable:$false] %s1768_s11 }
 0x16c   : > { %p1766_p2 = pnand %p1765_p1, %p1909_p5  ;;  %s1770_s13 = scalar_lea.vmem %s1769_s11, 256 }
 0x16d   : > { %p1771_p4 = scmp.lt.s32.totalorder %s2206_s9, %s1769_s11  ;;  %p1772_p7 = scmp.lt.s32.totalorder %s1770_s13, %s1764_s12 }
 0x16e   : > { %p1767_p3 = pneg %p1766_p2 }
 0x16f   : > { %p1773_p8 = por %p1772_p7, %p1771_p4 }
 0x171   : > { %p1774_p9 = pnand %p1773_p8, %p1767_p3 }
 0x1c8   : > { %v1580_v63 = vpop.f32.mrb[0].mxu1 }
 0x1c9   : > { %786 = vst.msk [vmem:[%s2133_s20 + $0x8] sm:$0xff] %vm784_vm1, %v1580_v63  ;;  %v625_v0 = vpop.f32.mrb[1].mxu1 }
 0x1ca   : > { %785 = vst.msk [vmem:[%s2133_s20] sm:$0xff] %vm784_vm1, %v625_v0 }
 0x1cc   : > { %v1583_v1 = vpop.f32.mrb[2].mxu1 }
 0x1cd   : > { %788 = vst.msk [vmem:[%s2133_s20 + $0x18] sm:$0xff] %vm784_vm1, %v1583_v1  ;;  %v635_v2 = vpop.f32.mrb[3].mxu1 }
 0x1ce   : > { %787 = vst.msk [vmem:[%s2133_s20 + $0x10] sm:$0xff] %vm784_vm1, %v635_v2 }
 0x1d0   : > { %v1586_v3 = vpop.f32.mrb[4].mxu1 }
 0x1d1   : > { %790 = vst.msk [vmem:[%s2133_s20 + $0x28] sm:$0xff] %vm784_vm1, %v1586_v3  ;;  %v645_v4 = vpop.f32.mrb[5].mxu1 }
 0x1d2   : > { %789 = vst.msk [vmem:[%s2133_s20 + $0x20] sm:$0xff] %vm784_vm1, %v645_v4 }
 0x1d4   : > { %v1589_v5 = vpop.f32.mrb[6].mxu1 }
 0x1d5   : > { %792 = vst.msk [vmem:[%s2133_s20 + $0x38] sm:$0xff] %vm784_vm1, %v1589_v5  ;;  %v655_v6 = vpop.f32.mrb[7].mxu1 }
 0x1d6   : > { %791 = vst.msk [vmem:[%s2133_s20 + $0x30] sm:$0xff] %vm784_vm1, %v655_v6 }
 0x1d8   : > { %v1592_v7 = vpop.f32.mrb[8].mxu1 }
 0x1d9   : > { %794 = vst.msk [vmem:[%s2133_s20 + $0x48] sm:$0xff] %vm784_vm1, %v1592_v7  ;;  %v665_v8 = vpop.f32.mrb[9].mxu1 }
 0x1da   : > { %793 = vst.msk [vmem:[%s2133_s20 + $0x40] sm:$0xff] %vm784_vm1, %v665_v8 }
 0x1dc   : > { %v1595_v9 = vpop.f32.mrb[10].mxu1 }
 0x1dd   : > { %796 = vst.msk [vmem:[%s2133_s20 + $0x58] sm:$0xff] %vm784_vm1, %v1595_v9  ;;  %v675_v10 = vpop.f32.mrb[11].mxu1 }
 0x1de   : > { %795 = vst.msk [vmem:[%s2133_s20 + $0x50] sm:$0xff] %vm784_vm1, %v675_v10 }
 0x1e0   : > { %v1598_v11 = vpop.f32.mrb[12].mxu1 }
 0x1e1   : > { %798 = vst.msk [vmem:[%s2133_s20 + $0x68] sm:$0xff] %vm784_vm1, %v1598_v11  ;;  %v685_v12 = vpop.f32.mrb[13].mxu1 }
 0x1e2   : > { %797 = vst.msk [vmem:[%s2133_s20 + $0x60] sm:$0xff] %vm784_vm1, %v685_v12 }
 0x1e4   : > { %v1601_v13 = vpop.f32.mrb[14].mxu1 }
 0x1e5   : > { %800 = vst.msk [vmem:[%s2133_s20 + $0x78] sm:$0xff] %vm784_vm1, %v1601_v13  ;;  %v695_v14 = vpop.f32.mrb[15].mxu1 }
 0x1e6   : > { %799 = vst.msk [vmem:[%s2133_s20 + $0x70] sm:$0xff] %vm784_vm1, %v695_v14 }
 0x1e8   : > { %v1604_v15 = vpop.f32.mrb[16].mxu1 }
 0x1e9   : > { %802 = vst.msk [vmem:[%s2133_s20 + $0x88] sm:$0xff] %vm784_vm1, %v1604_v15  ;;  %v705_v16 = vpop.f32.mrb[17].mxu1 }
 0x1ea   : > { %801 = vst.msk [vmem:[%s2133_s20 + $0x80] sm:$0xff] %vm784_vm1, %v705_v16 }
 0x1ec   : > { %v1607_v17 = vpop.f32.mrb[18].mxu1 }
 0x1ed   : > { %804 = vst.msk [vmem:[%s2133_s20 + $0x98] sm:$0xff] %vm784_vm1, %v1607_v17  ;;  %v715_v18 = vpop.f32.mrb[19].mxu1 }
 0x1ee   : > { %803 = vst.msk [vmem:[%s2133_s20 + $0x90] sm:$0xff] %vm784_vm1, %v715_v18 }
 0x1f0   : > { %v1610_v19 = vpop.f32.mrb[20].mxu1 }
 0x1f1   : > { %806 = vst.msk [vmem:[%s2133_s20 + $0xa8] sm:$0xff] %vm784_vm1, %v1610_v19  ;;  %v725_v20 = vpop.f32.mrb[21].mxu1 }
 0x1f2   : > { %805 = vst.msk [vmem:[%s2133_s20 + $0xa0] sm:$0xff] %vm784_vm1, %v725_v20 }
 0x1f4   : > { %v1613_v21 = vpop.f32.mrb[22].mxu1 }
 0x1f5   : > { %808 = vst.msk [vmem:[%s2133_s20 + $0xb8] sm:$0xff] %vm784_vm1, %v1613_v21  ;;  %v735_v22 = vpop.f32.mrb[23].mxu1 }
 0x1f6   : > { %807 = vst.msk [vmem:[%s2133_s20 + $0xb0] sm:$0xff] %vm784_vm1, %v735_v22 }
 0x1f8   : > { %v1616_v23 = vpop.f32.mrb[24].mxu1 }
 0x1f9   : > { %810 = vst.msk [vmem:[%s2133_s20 + $0xc8] sm:$0xff] %vm784_vm1, %v1616_v23  ;;  %v745_v24 = vpop.f32.mrb[25].mxu1 }
 0x1fa   : > { %809 = vst.msk [vmem:[%s2133_s20 + $0xc0] sm:$0xff] %vm784_vm1, %v745_v24 }
 0x1fc   : > { %v1619_v25 = vpop.f32.mrb[26].mxu1 }
 0x1fd   : > { %812 = vst.msk [vmem:[%s2133_s20 + $0xd8] sm:$0xff] %vm784_vm1, %v1619_v25  ;;  %v755_v26 = vpop.f32.mrb[27].mxu1 }
 0x1fe   : > { %811 = vst.msk [vmem:[%s2133_s20 + $0xd0] sm:$0xff] %vm784_vm1, %v755_v26 }
 0x200   : > { %v1622_v27 = vpop.f32.mrb[28].mxu1 }
 0x201   : > { %814 = vst.msk [vmem:[%s2133_s20 + $0xe8] sm:$0xff] %vm784_vm1, %v1622_v27  ;;  %v765_v28 = vpop.f32.mrb[29].mxu1 }
 0x202   : > { %813 = vst.msk [vmem:[%s2133_s20 + $0xe0] sm:$0xff] %vm784_vm1, %v765_v28 }
 0x204   : > { %v1625_v29 = vpop.f32.mrb[30].mxu1 }
 0x205   : > { %816 = vst.msk [vmem:[%s2133_s20 + $0xf8] sm:$0xff] %vm784_vm1, %v1625_v29  ;;  %v775_v30 = vpop.f32.mrb[31].mxu1 }
 0x206   : > { %815 = vst.msk [vmem:[%s2133_s20 + $0xf0] sm:$0xff] %vm784_vm1, %v775_v30 }
 0x22a   : > { %v884_v31 = vpop.f32.mrb[32].mxu0 }
 0x22b   : > { %v886_v32 = vpop.f32.mrb[33].mxu0 }
 0x22c   : > { %v891_v33 = vcombine.low %v884_v31, %v886_v32 }
 0x22e   : > { %893 = vst [vmem:[%s256_s26] sm:$0xff] %v891_v33 }
 0x22f   : > { %1777 = shalt.err (!%p1774_p9)
}
 0x230   : > { %s1778_s19 = scalar_lea.hbm %s2204_s28, 128  ;;  %s1782_s20 = scalar_lea.hbm %s2252_s5, 256 }
 0x231   : > { %p1779_p10 = scmp.ne.s32.totalorder %s2204_s28, %s1778_s19  ;;  %p1783_p13 = scmp.lt.u32.totalorder %s2204_s28, %s2252_s5 }
 0x232   : > { %p1784_p0 = scmp.lt.u32.totalorder %s1782_s20, %s1778_s19  ;;  %p1786_p2 = scmp.lt.u32.totalorder %s1778_s19, %s2204_s28 }
 0x233   : > { %p1780_p11 = pnand %p1779_p10, %p1909_p5 }
 0x234   : > { %p1785_p1 = por %p1784_p0, %p1783_p13 }
 0x235   : > { %p1781_p12 = pneg %p1780_p11 }
 0x236   : > { %p1787_p3 = por %p1786_p2, %p1785_p1 }
 0x238   : > { %p1788_p4 = pnand %p1787_p3, %p1781_p12 }
 0x23a   : > { %1791 = shalt.err (!%p1788_p4)
}
 0x23b   : > { %1691 = dma.vmem_to_hbm [thread:$0]  (%p1909_p5), %s2206_s9, 128, %s2204_s28, %s1060_s29  }
 0x23c PF: > { %p1701_p7 = scmp.ge.s32.totalorder %s1830_s24, 2  ;;  %s1111_s26 = sand.u32 1, %s1818_s21  }
 0x23d   : > { %s1112_s10 = scalar_lea.sflag [#allocation3], %s1111_s26 }
 0x23e   : > { %p1695_p8 = pnand %p1701_p7, %p1913_p6 }
 0x240   : > { %1809 = dma.done.wait (!%p1695_p8), %s1112_s10, 2048  }
 0x241   : > { %1811 = vsyncadd (!%p1695_p8), %s1112_s10, 4294965248  ;;  %s1121_s17 = scalar_lea.sflag [#allocation5], %s1111_s26 }
 0x242   : > { %1813 = dma.done.wait (!%p1695_p8), %s1121_s17, 128  }
 0x243   : > { %1815 = vsyncadd (!%p1695_p8), %s1121_s17, 4294967168  ;;  %p20_p5 = scmp.ge.s32.totalorder %s1896_s27, 4   ;;  %s2256_s21 = smov %s1822_s22 }
 0x244   : > { %s2257_s22 = smov %s1826_s23  ;;  %s2258_s23 = smov %s1907_s30 }
 0x245   : > { %s2259_s24 = smov %s1896_s27  ;;  %22 = sbr.rel (!%p20_p5) target bundleno = 5 (0x5), region = 100 }
 0x24c   :  { %1134 = vsyncpa [#allocation3], 1 }
 0x24d   :  { %1136 = vsyncpa [#allocation3 + $0x1], 1 }
 0x24e   :  { %1137 = vsyncpa [#allocation5], 1 }
 0x24f   :  { %1139 = vsyncpa [#allocation5 + $0x1], 1 }

</bundles_post_ra>
